<compile_context>
chip_gen: v6e
topology: v6e:2x2x1
jax: 0.10.0
libtpu: 0.0.40
codegen_flags: <defaults>
</compile_context>

<pallas_src>
import functools

import jax
import jax.numpy as jnp
from jax import lax
from jax.experimental import pallas as pl
from jax.experimental.pallas import tpu as pltpu


def _attention_kernel(x_ref, wqkv_ref, wp_ref, bp_ref, o_ref, *, num_heads):
    n, c = x_ref.shape
    hd = c // num_heads

    x = x_ref[...]                                                       # (N, C) bf16
    # Fused Q|K|V projection (attention scale already folded into Q columns).
    qkv = jnp.dot(x, wqkv_ref[...], preferred_element_type=jnp.float32)  # (N, 3C) f32
    qkv = qkv.astype(jnp.bfloat16)

    # Start the accumulator from the projection bias (saves a final add pass).
    acc = jnp.broadcast_to(bp_ref[...], (n, c)).astype(jnp.float32)

    for h in range(num_heads):                     # static unroll over heads
        lo = h * hd
        qh = qkv[:, lo:lo + hd]                    # (N, hd) bf16
        kh = qkv[:, c + lo:c + lo + hd]            # (N, hd) bf16
        vh = qkv[:, 2 * c + lo:2 * c + lo + hd]    # (N, hd) bf16

        # Scores: contract the last dim of q and k (no kh.T materialization).
        s = lax.dot_general(qh, kh, (((1,), (1,)), ((), ())),
                            preferred_element_type=jnp.float32)          # (N, N) f32
        s = s - jnp.max(s, axis=-1, keepdims=True)
        p = jnp.exp(s)                                                    # EUP
        inv = pl.reciprocal(jnp.sum(p, axis=-1, keepdims=True), approx=True)
        p = (p * inv).astype(jnp.bfloat16)

        oh = jnp.dot(p, vh, preferred_element_type=jnp.float32)          # (N, hd) f32
        # Accumulate through the matching sublane slice of the proj weight
        # (avoids a lane-axis concatenate of all head outputs).
        acc = acc + jnp.dot(oh.astype(jnp.bfloat16), wp_ref[lo:lo + hd, :],
                            preferred_element_type=jnp.float32)

    o_ref[...] = acc.astype(o_ref.dtype)


def attention_forward(x, params, *, num_heads):
    """x: [B, N, C] float32.  params: wq/wk/wv/wp [C, C] (pre-transposed), bp [1, C]."""
    B, N, C = x.shape
    hd = C // num_heads
    attn_scale = float(hd) ** (-0.5)

    # Fuse Q/K/V weights and fold the attention scale into the Q projection.
    wqkv = jnp.concatenate(
        [params["wq"] * attn_scale, params["wk"], params["wv"]], axis=1
    ).astype(jnp.bfloat16)                               # (C, 3C)
    wp = params["wp"].astype(jnp.bfloat16)               # (C, C)
    bp = params["bp"].reshape(1, C).astype(jnp.float32)  # (1, C)

    x_bf = x.astype(jnp.bfloat16)

    kernel = functools.partial(_attention_kernel, num_heads=num_heads)

    return pl.pallas_call(
        kernel,
        out_shape=jax.ShapeDtypeStruct((B, N, C), x.dtype),
        grid_spec=pltpu.PrefetchScalarGridSpec(
            num_scalar_prefetch=0,
            grid=(B,),
            in_specs=[
                pl.BlockSpec((pl.Squeezed(), N, C), lambda b: (b, 0, 0)),
                pl.BlockSpec((C, 3 * C), lambda b: (0, 0)),   # resident weights
                pl.BlockSpec((C, C), lambda b: (0, 0)),
                pl.BlockSpec((1, C), lambda b: (0, 0)),
            ],
            out_specs=pl.BlockSpec((pl.Squeezed(), N, C), lambda b: (b, 0, 0)),
        ),
        compiler_params=pltpu.CompilerParams(
            dimension_semantics=("parallel",),
            vmem_limit_bytes=48 * 1024 * 1024,
        ),
    )(x_bf, wqkv, wp, bp)


# ---------------- pure-JAX reference (PyTorch semantics, f32) ----------------
def attention_reference(x, params, *, num_heads):
    B, N, C = x.shape
    hd = C // num_heads
    scale = float(hd) ** (-0.5)

    q = x @ params["wq"]
    k = x @ params["wk"]
    v = x @ params["wv"]
    q = q.reshape(B, N, num_heads, hd).transpose(0, 2, 1, 3)
    k = k.reshape(B, N, num_heads, hd).transpose(0, 2, 1, 3)
    v = v.reshape(B, N, num_heads, hd).transpose(0, 2, 1, 3)
    attn = jax.nn.softmax(jnp.einsum("bhqd,bhkd->bhqk", q, k) * scale, axis=-1)
    out = jnp.einsum("bhqk,bhkd->bhqd", attn, v).transpose(0, 2, 1, 3).reshape(B, N, C)
    return out @ params["wp"] + params["bp"]


if __name__ == "__main__":
    B, N, C = 2, 8, 32
    num_heads = 4           # head_dim = 8

    key = jax.random.PRNGKey(0)
    ks = jax.random.split(key, 6)

    def rnd(k, shape, s=0.05):
        return jax.random.normal(k, shape, dtype=jnp.float32) * s

    params = {
        "wq": rnd(ks[0], (C, C)),
        "wk": rnd(ks[1], (C, C)),
        "wv": rnd(ks[2], (C, C)),
        "wp": rnd(ks[3], (C, C)),
        "bp": rnd(ks[4], (1, C)),
    }
    # TODO(synk): attn_drop / proj_drop are nn.Dropout — identity at inference,
    # not implemented as stochastic ops in the kernel.

    x = jax.random.normal(ks[5], (B, N, C), dtype=jnp.float32)

    out = attention_forward(x, params, num_heads=num_heads)
    out = jax.block_until_ready(out)

    ref = attention_reference(x, params, num_heads=num_heads)
    assert out.shape == (B, N, C)
    max_diff = jnp.max(jnp.abs(out - ref))
    assert jnp.allclose(out, ref, atol=2e-2, rtol=2e-2), (
        f"max abs diff {max_diff}")

    print("KERNEL_OK")
</pallas_src>

<mosaic_0001>
module attributes {stable_mosaic.version = 11 : i64} {
  func.func @_attention_kernel(%arg0: i32, %arg1: memref<1x8x32xbf16, #tpu.memory_space<vmem>>, %arg2: memref<32x96xbf16, #tpu.memory_space<vmem>>, %arg3: memref<32x32xbf16, #tpu.memory_space<vmem>>, %arg4: memref<1x32xf32, #tpu.memory_space<vmem>>, %arg5: memref<1x8x32xf32, #tpu.memory_space<vmem>>) attributes {dimension_semantics = [#tpu.dimension_semantics<parallel>], iteration_bounds = array<i64: 2>, scalar_prefetch = 0 : i64, scratch_operands = 0 : i64, tpu.core_type = #tpu.core_type<tc>, window_params = [{transform_indices = @transform_0, window_bounds = array<i64: 1, 8, 32>}, {pipeline_mode = #tpu.pipeline_mode<synchronous>, transform_indices = @transform_1, window_bounds = array<i64: 32, 96>}, {pipeline_mode = #tpu.pipeline_mode<synchronous>, transform_indices = @transform_2, window_bounds = array<i64: 32, 32>}, {pipeline_mode = #tpu.pipeline_mode<synchronous>, transform_indices = @transform_3, window_bounds = array<i64: 1, 32>}, {transform_indices = @transform_4, window_bounds = array<i64: 1, 8, 32>}]} {
    %c0 = arith.constant 0 : index
    %c0_0 = arith.constant 0 : index
    %c0_1 = arith.constant 0 : index
    %0 = vector.load %arg1[%c0, %c0_0, %c0_1] : memref<1x8x32xbf16, #tpu.memory_space<vmem>>, vector<1x8x32xbf16>
    %1 = vector.shape_cast %0 : vector<1x8x32xbf16> to vector<8x32xbf16>
    %c0_2 = arith.constant 0 : index
    %c0_3 = arith.constant 0 : index
    %2 = vector.load %arg2[%c0_2, %c0_3] : memref<32x96xbf16, #tpu.memory_space<vmem>>, vector<32x96xbf16>
    %cst = arith.constant dense<0.000000e+00> : vector<8x96xf32>
    %3 = tpu.matmul %1, %2, %cst {dimension_numbers = #tpu.dot_dimension_numbers<[1], [0], [0], [1], [0, 0, 1, 1], [], []>} : vector<8x32xbf16>, vector<32x96xbf16>, vector<8x96xf32> -> vector<8x96xf32>
    %4 = arith.truncf %3 : vector<8x96xf32> to vector<8x96xbf16>
    %c0_4 = arith.constant 0 : index
    %c0_5 = arith.constant 0 : index
    %5 = vector.load %arg4[%c0_4, %c0_5] : memref<1x32xf32, #tpu.memory_space<vmem>>, vector<1x32xf32>
    %6 = vector.shape_cast %5 : vector<1x32xf32> to vector<1x32xf32>
    %7 = vector.broadcast %6 : vector<1x32xf32> to vector<8x32xf32>
    %8 = vector.extract_strided_slice %4 {offsets = [0, 0], sizes = [8, 8], strides = [1, 1]} : vector<8x96xbf16> to vector<8x8xbf16>
    %9 = vector.extract_strided_slice %4 {offsets = [0, 32], sizes = [8, 8], strides = [1, 1]} : vector<8x96xbf16> to vector<8x8xbf16>
    %10 = vector.extract_strided_slice %4 {offsets = [0, 64], sizes = [8, 8], strides = [1, 1]} : vector<8x96xbf16> to vector<8x8xbf16>
    %cst_6 = arith.constant dense<0.000000e+00> : vector<8x8xf32>
    %11 = tpu.matmul %8, %9, %cst_6 {dimension_numbers = #tpu.dot_dimension_numbers<[1], [1], [0], [0], [0, 0, 1, 0], [], []>} : vector<8x8xbf16>, vector<8x8xbf16>, vector<8x8xf32> -> vector<8x8xf32>
    %cst_7 = arith.constant dense<0xFF800000> : vector<8xf32>
    %12 = vector.multi_reduction <maximumf>, %11, %cst_7 [1] : vector<8x8xf32> to vector<8xf32>
    %13 = vector.shape_cast %12 : vector<8xf32> to vector<8x1xf32>
    %14 = vector.broadcast %13 : vector<8x1xf32> to vector<8x8xf32>
    %15 = arith.subf %11, %14 : vector<8x8xf32>
    %16 = math.exp %15 : vector<8x8xf32>
    %cst_8 = arith.constant dense<0.000000e+00> : vector<8xf32>
    %17 = vector.multi_reduction <add>, %16, %cst_8 [1] : vector<8x8xf32> to vector<8xf32>
    %18 = vector.shape_cast %17 : vector<8xf32> to vector<8x1xf32>
    %19 = tpu.reciprocal %18 {approx = true} : vector<8x1xf32> -> vector<8x1xf32>
    %20 = vector.broadcast %19 : vector<8x1xf32> to vector<8x8xf32>
    %21 = arith.mulf %16, %20 : vector<8x8xf32>
    %22 = arith.truncf %21 : vector<8x8xf32> to vector<8x8xbf16>
    %cst_9 = arith.constant dense<0.000000e+00> : vector<8x8xf32>
    %23 = tpu.matmul %22, %10, %cst_9 {dimension_numbers = #tpu.dot_dimension_numbers<[1], [0], [0], [1], [0, 0, 1, 1], [], []>} : vector<8x8xbf16>, vector<8x8xbf16>, vector<8x8xf32> -> vector<8x8xf32>
    %24 = arith.truncf %23 : vector<8x8xf32> to vector<8x8xbf16>
    %c0_10 = arith.constant 0 : index
    %c0_11 = arith.constant 0 : index
    %25 = vector.load %arg3[%c0_10, %c0_11] : memref<32x32xbf16, #tpu.memory_space<vmem>>, vector<8x32xbf16>
    %cst_12 = arith.constant dense<0.000000e+00> : vector<8x32xf32>
    %26 = tpu.matmul %24, %25, %cst_12 {dimension_numbers = #tpu.dot_dimension_numbers<[1], [0], [0], [1], [0, 0, 1, 1], [], []>} : vector<8x8xbf16>, vector<8x32xbf16>, vector<8x32xf32> -> vector<8x32xf32>
    %27 = arith.addf %7, %26 : vector<8x32xf32>
    %28 = vector.extract_strided_slice %4 {offsets = [0, 8], sizes = [8, 8], strides = [1, 1]} : vector<8x96xbf16> to vector<8x8xbf16>
    %29 = vector.extract_strided_slice %4 {offsets = [0, 40], sizes = [8, 8], strides = [1, 1]} : vector<8x96xbf16> to vector<8x8xbf16>
    %30 = vector.extract_strided_slice %4 {offsets = [0, 72], sizes = [8, 8], strides = [1, 1]} : vector<8x96xbf16> to vector<8x8xbf16>
    %cst_13 = arith.constant dense<0.000000e+00> : vector<8x8xf32>
    %31 = tpu.matmul %28, %29, %cst_13 {dimension_numbers = #tpu.dot_dimension_numbers<[1], [1], [0], [0], [0, 0, 1, 0], [], []>} : vector<8x8xbf16>, vector<8x8xbf16>, vector<8x8xf32> -> vector<8x8xf32>
    %cst_14 = arith.constant dense<0xFF800000> : vector<8xf32>
    %32 = vector.multi_reduction <maximumf>, %31, %cst_14 [1] : vector<8x8xf32> to vector<8xf32>
    %33 = vector.shape_cast %32 : vector<8xf32> to vector<8x1xf32>
    %34 = vector.broadcast %33 : vector<8x1xf32> to vector<8x8xf32>
    %35 = arith.subf %31, %34 : vector<8x8xf32>
    %36 = math.exp %35 : vector<8x8xf32>
    %cst_15 = arith.constant dense<0.000000e+00> : vector<8xf32>
    %37 = vector.multi_reduction <add>, %36, %cst_15 [1] : vector<8x8xf32> to vector<8xf32>
    %38 = vector.shape_cast %37 : vector<8xf32> to vector<8x1xf32>
    %39 = tpu.reciprocal %38 {approx = true} : vector<8x1xf32> -> vector<8x1xf32>
    %40 = vector.broadcast %39 : vector<8x1xf32> to vector<8x8xf32>
    %41 = arith.mulf %36, %40 : vector<8x8xf32>
    %42 = arith.truncf %41 : vector<8x8xf32> to vector<8x8xbf16>
    %cst_16 = arith.constant dense<0.000000e+00> : vector<8x8xf32>
    %43 = tpu.matmul %42, %30, %cst_16 {dimension_numbers = #tpu.dot_dimension_numbers<[1], [0], [0], [1], [0, 0, 1, 1], [], []>} : vector<8x8xbf16>, vector<8x8xbf16>, vector<8x8xf32> -> vector<8x8xf32>
    %44 = arith.truncf %43 : vector<8x8xf32> to vector<8x8xbf16>
    %c8 = arith.constant 8 : index
    %c0_17 = arith.constant 0 : index
    %45 = vector.load %arg3[%c8, %c0_17] : memref<32x32xbf16, #tpu.memory_space<vmem>>, vector<8x32xbf16>
    %cst_18 = arith.constant dense<0.000000e+00> : vector<8x32xf32>
    %46 = tpu.matmul %44, %45, %cst_18 {dimension_numbers = #tpu.dot_dimension_numbers<[1], [0], [0], [1], [0, 0, 1, 1], [], []>} : vector<8x8xbf16>, vector<8x32xbf16>, vector<8x32xf32> -> vector<8x32xf32>
    %47 = arith.addf %27, %46 : vector<8x32xf32>
    %48 = vector.extract_strided_slice %4 {offsets = [0, 16], sizes = [8, 8], strides = [1, 1]} : vector<8x96xbf16> to vector<8x8xbf16>
    %49 = vector.extract_strided_slice %4 {offsets = [0, 48], sizes = [8, 8], strides = [1, 1]} : vector<8x96xbf16> to vector<8x8xbf16>
    %50 = vector.extract_strided_slice %4 {offsets = [0, 80], sizes = [8, 8], strides = [1, 1]} : vector<8x96xbf16> to vector<8x8xbf16>
    %cst_19 = arith.constant dense<0.000000e+00> : vector<8x8xf32>
    %51 = tpu.matmul %48, %49, %cst_19 {dimension_numbers = #tpu.dot_dimension_numbers<[1], [1], [0], [0], [0, 0, 1, 0], [], []>} : vector<8x8xbf16>, vector<8x8xbf16>, vector<8x8xf32> -> vector<8x8xf32>
    %cst_20 = arith.constant dense<0xFF800000> : vector<8xf32>
    %52 = vector.multi_reduction <maximumf>, %51, %cst_20 [1] : vector<8x8xf32> to vector<8xf32>
    %53 = vector.shape_cast %52 : vector<8xf32> to vector<8x1xf32>
    %54 = vector.broadcast %53 : vector<8x1xf32> to vector<8x8xf32>
    %55 = arith.subf %51, %54 : vector<8x8xf32>
    %56 = math.exp %55 : vector<8x8xf32>
    %cst_21 = arith.constant dense<0.000000e+00> : vector<8xf32>
    %57 = vector.multi_reduction <add>, %56, %cst_21 [1] : vector<8x8xf32> to vector<8xf32>
    %58 = vector.shape_cast %57 : vector<8xf32> to vector<8x1xf32>
    %59 = tpu.reciprocal %58 {approx = true} : vector<8x1xf32> -> vector<8x1xf32>
    %60 = vector.broadcast %59 : vector<8x1xf32> to vector<8x8xf32>
    %61 = arith.mulf %56, %60 : vector<8x8xf32>
    %62 = arith.truncf %61 : vector<8x8xf32> to vector<8x8xbf16>
    %cst_22 = arith.constant dense<0.000000e+00> : vector<8x8xf32>
    %63 = tpu.matmul %62, %50, %cst_22 {dimension_numbers = #tpu.dot_dimension_numbers<[1], [0], [0], [1], [0, 0, 1, 1], [], []>} : vector<8x8xbf16>, vector<8x8xbf16>, vector<8x8xf32> -> vector<8x8xf32>
    %64 = arith.truncf %63 : vector<8x8xf32> to vector<8x8xbf16>
    %c16 = arith.constant 16 : index
    %c0_23 = arith.constant 0 : index
    %65 = vector.load %arg3[%c16, %c0_23] : memref<32x32xbf16, #tpu.memory_space<vmem>>, vector<8x32xbf16>
    %cst_24 = arith.constant dense<0.000000e+00> : vector<8x32xf32>
    %66 = tpu.matmul %64, %65, %cst_24 {dimension_numbers = #tpu.dot_dimension_numbers<[1], [0], [0], [1], [0, 0, 1, 1], [], []>} : vector<8x8xbf16>, vector<8x32xbf16>, vector<8x32xf32> -> vector<8x32xf32>
    %67 = arith.addf %47, %66 : vector<8x32xf32>
    %68 = vector.extract_strided_slice %4 {offsets = [0, 24], sizes = [8, 8], strides = [1, 1]} : vector<8x96xbf16> to vector<8x8xbf16>
    %69 = vector.extract_strided_slice %4 {offsets = [0, 56], sizes = [8, 8], strides = [1, 1]} : vector<8x96xbf16> to vector<8x8xbf16>
    %70 = vector.extract_strided_slice %4 {offsets = [0, 88], sizes = [8, 8], strides = [1, 1]} : vector<8x96xbf16> to vector<8x8xbf16>
    %cst_25 = arith.constant dense<0.000000e+00> : vector<8x8xf32>
    %71 = tpu.matmul %68, %69, %cst_25 {dimension_numbers = #tpu.dot_dimension_numbers<[1], [1], [0], [0], [0, 0, 1, 0], [], []>} : vector<8x8xbf16>, vector<8x8xbf16>, vector<8x8xf32> -> vector<8x8xf32>
    %cst_26 = arith.constant dense<0xFF800000> : vector<8xf32>
    %72 = vector.multi_reduction <maximumf>, %71, %cst_26 [1] : vector<8x8xf32> to vector<8xf32>
    %73 = vector.shape_cast %72 : vector<8xf32> to vector<8x1xf32>
    %74 = vector.broadcast %73 : vector<8x1xf32> to vector<8x8xf32>
    %75 = arith.subf %71, %74 : vector<8x8xf32>
    %76 = math.exp %75 : vector<8x8xf32>
    %cst_27 = arith.constant dense<0.000000e+00> : vector<8xf32>
    %77 = vector.multi_reduction <add>, %76, %cst_27 [1] : vector<8x8xf32> to vector<8xf32>
    %78 = vector.shape_cast %77 : vector<8xf32> to vector<8x1xf32>
    %79 = tpu.reciprocal %78 {approx = true} : vector<8x1xf32> -> vector<8x1xf32>
    %80 = vector.broadcast %79 : vector<8x1xf32> to vector<8x8xf32>
    %81 = arith.mulf %76, %80 : vector<8x8xf32>
    %82 = arith.truncf %81 : vector<8x8xf32> to vector<8x8xbf16>
    %cst_28 = arith.constant dense<0.000000e+00> : vector<8x8xf32>
    %83 = tpu.matmul %82, %70, %cst_28 {dimension_numbers = #tpu.dot_dimension_numbers<[1], [0], [0], [1], [0, 0, 1, 1], [], []>} : vector<8x8xbf16>, vector<8x8xbf16>, vector<8x8xf32> -> vector<8x8xf32>
    %84 = arith.truncf %83 : vector<8x8xf32> to vector<8x8xbf16>
    %c24 = arith.constant 24 : index
    %c0_29 = arith.constant 0 : index
    %85 = vector.load %arg3[%c24, %c0_29] : memref<32x32xbf16, #tpu.memory_space<vmem>>, vector<8x32xbf16>
    %cst_30 = arith.constant dense<0.000000e+00> : vector<8x32xf32>
    %86 = tpu.matmul %84, %85, %cst_30 {dimension_numbers = #tpu.dot_dimension_numbers<[1], [0], [0], [1], [0, 0, 1, 1], [], []>} : vector<8x8xbf16>, vector<8x32xbf16>, vector<8x32xf32> -> vector<8x32xf32>
    %87 = arith.addf %67, %86 : vector<8x32xf32>
    %c0_31 = arith.constant 0 : index
    %c0_32 = arith.constant 0 : index
    %c0_33 = arith.constant 0 : index
    %88 = vector.load %arg5[%c0_31, %c0_32, %c0_33] : memref<1x8x32xf32, #tpu.memory_space<vmem>>, vector<1x8x32xf32>
    %89 = vector.shape_cast %88 : vector<1x8x32xf32> to vector<8x32xf32>
    %90 = vector.shape_cast %87 : vector<8x32xf32> to vector<1x8x32xf32>
    tpu.vector_store %arg5[%c0_31, %c0_32, %c0_33], %90 {strides = array<i32>} : memref<1x8x32xf32, #tpu.memory_space<vmem>>, vector<1x8x32xf32>,
    return
  }
  func.func @transform_0(%arg0: i32) -> (i32, i32, i32) {
    %c0_i32 = arith.constant 0 : i32
    %c0_i32_0 = arith.constant 0 : i32
    %c0_i32_1 = arith.constant 0 : i32
    return %arg0, %c0_i32, %c0_i32_0 : i32, i32, i32
  }
  func.func @transform_1(%arg0: i32) -> (i32, i32) {
    %c0_i32 = arith.constant 0 : i32
    %c0_i32_0 = arith.constant 0 : i32
    %c0_i32_1 = arith.constant 0 : i32
    return %c0_i32, %c0_i32_0 : i32, i32
  }
  func.func @transform_2(%arg0: i32) -> (i32, i32) {
    %c0_i32 = arith.constant 0 : i32
    %c0_i32_0 = arith.constant 0 : i32
    %c0_i32_1 = arith.constant 0 : i32
    return %c0_i32, %c0_i32_0 : i32, i32
  }
  func.func @transform_3(%arg0: i32) -> (i32, i32) {
    %c0_i32 = arith.constant 0 : i32
    %c0_i32_0 = arith.constant 0 : i32
    %c0_i32_1 = arith.constant 0 : i32
    return %c0_i32, %c0_i32_0 : i32, i32
  }
  func.func @transform_4(%arg0: i32) -> (i32, i32, i32) {
    %c0_i32 = arith.constant 0 : i32
    %c0_i32_0 = arith.constant 0 : i32
    %c0_i32_1 = arith.constant 0 : i32
    return %arg0, %c0_i32, %c0_i32_0 : i32, i32, i32
  }
}

</mosaic_0001>

<bundles_post_ra>
// kernel: tpu_custom_call.1
= control target key start
LH: loop header
LB: loop body
LE: loop exit
PB: predicated region body
PF: predicated region fallthrough
CT: control target
= control target key end

     0   :  { %9 = vsyncpa [#allocation3], 0  ;;  %s1755_s0 = inlined_call_operand.hbm [shape: bf16[2,8,32], index: 0, kind: input, shape index: {}]   ;;  %s1756_s1 = inlined_call_operand.hbm [shape: bf16[32,96], index: 1, kind: input, shape index: {}]   ;;  %s1757_s2 = inlined_call_operand.hbm [shape: bf16[32,32], index: 2, kind: input, shape index: {}]   ;;  %s1758_s3 = inlined_call_operand.vmem [shape: f32[1,32], index: 3, kind: input, shape index: {}]   ;;  %s1759_s4 = inlined_call_operand.hbm [shape: f32[2,8,32], index: 4, kind: output, shape index: {}]  }
   0x1   :  { %11 = vsyncpa [#allocation3 + $0x1], 0 }
   0x2   :  { %12 = vsyncpa [#allocation6], 0 }
   0x3   :  { %13 = vsyncpa [#allocation4], 0 }
   0x4   :  { %15 = vsyncpa [#allocation4 + $0x1], 0  ;;  %s1486_s15 = smov 0   ;;  %s1488_s16 = smov 0  }
   0x5   :  { %s1490_s17 = smov 0   ;;  %s1492_s18 = smov 0  }
   0x6 LB: > { %s1507_s19 = sadd.s32 4294967295, %s1440_s18   ;;  %s1053_s20 = sadd.s32 4294967294, %s1440_s18   ;;  %s1440_s18 = sphi %s1492_s18, %s1781_s18   ;;  %s1436_s17 = sphi %s1490_s17, %s1780_s17   ;;  %s1432_s16 = sphi %s1488_s16, %s1779_s16   ;;  %s1428_s15 = sphi %s1486_s15, %s1778_s15  }
   0x7   : > { %p41_p0 = scmp.ne.s32.totalorder %s1432_s16, %s1428_s15  ;;  %p1760_p1 = scmp.eq.s32.totalorder %s1507_s19, 0 }
   0x8   : > { %p134_p3 = scmp.eq.s32.totalorder %s1053_s20, 1  ;;  %p1054_p5 = scmp.ge.s32.totalorder %s1440_s18, 1 }
   0x9   : > { %p1516_p4 = por %p1760_p1, %p41_p0  ;;  %p141_p7 = scmp.lt.s32.totalorder %s1440_s18, 3 }
   0xa   : > { %p1521_p6 = por %p134_p3, %p41_p0  ;;  %s1442_s24 = smov [#allocation5]  }
   0xb   : > { %s1764_s21 = scalar_select %p1516_p4, 1, 0 }
   0xc   : > { %s1765_s22 = scalar_select %p1521_p6, 1, 0 }
   0xd   : > { %p1526_p8 = pnand %p1054_p5, %p141_p7  ;;  %s153_s25 = sshll.u32 %s1442_s24, 4  ;;  %s154_s25 = int_to_ptr.vmem [resolvable:$true] %s153_s25 }
   0xe   : > { %s1443_s27 = smov [#allocation7]   ;;  %s1303_s29 = scalar_lea.vmem %s154_s25, 256 }
   0xf   : > { %s1766_s23 = scalar_select %p1526_p8, 1, 0 }
  0x10   : > { %p1204_p9 = pneg %p1526_p8  ;;  %s166_s28 = sshll.u32 %s1443_s27, 4  ;;  %s167_s28 = int_to_ptr.vmem [resolvable:$true] %s166_s28 }
  0x11   : > { %p1304_p13 = scmp.ne.s32.totalorder %s154_s25, %s1303_s29  ;;  %p1311_p5 = scmp.lt.s32.totalorder %s154_s25, %s154_s25 }
  0x12   : > { %p1535_p11 = pnand %p1204_p9, %p1760_p1  ;;  %p1312_p7 = scmp.lt.s32.totalorder %s1303_s29, %s1303_s29 }
  0x14   : > { %p1294_p12 = pneg %p1535_p11  ;;  %p1313_p10 = por %p1312_p7, %p1311_p5 }
  0x16   : > { %p1306_p0 = pnand %p1304_p13, %p1294_p12 }
  0x18   : > { %p1307_p3 = pneg %p1306_p0 }
  0x1a   : > { %p1314_p9 = pnand %p1313_p10, %p1307_p3 }
  0x1c   : > { %1317 = shalt.err (!%p1314_p9)
}
  0x1d   : > { %s1444_s30 = smov 64   ;;  %s1445_s5 = smov 4  }
  0x1e   : > { %1207 = dma.hbm_to_vmem [thread:$0]  (!%p1535_p11), %s1756_s1, 256, %s154_s25, [#allocation6], %s1444_s30, %s1444_s30, %s1445_s5  }
  0x1f   : > { %s1329_s8 = scalar_lea.vmem %s167_s28, 256  ;;  %p1337_p2 = scmp.lt.s32.totalorder %s167_s28, %s167_s28 }
  0x20   : > { %p1330_p1 = scmp.ne.s32.totalorder %s167_s28, %s1329_s8  ;;  %p1338_p6 = scmp.lt.s32.totalorder %s1329_s8, %s1329_s8 }
  0x22   : > { %p1332_p13 = pnand %p1330_p1, %p1294_p12  ;;  %p1339_p5 = por %p1338_p6, %p1337_p2 }
  0x24   : > { %p1333_p0 = pneg %p1332_p13 }
  0x26   : > { %p1340_p10 = pnand %p1339_p5, %p1333_p0 }
  0x28   : > { %1343 = shalt.err (!%p1340_p10)
}
  0x29   : > { %1210 = dma.hbm_to_vmem [thread:$0]  (!%p1535_p11), %s1757_s2, 256, %s167_s28, [#allocation6], %s1444_s30, %s1444_s30, %s1445_s5  }
  0x2a   : > { %s1558_s11 = sadd.s32 1, %s1440_s18   ;;  %s28_s12 = sadd.s32 1, %s1436_s17 }
  0x2b   : > { %s25_s13 = ssub.s32 %s1440_s18, %s1558_s11  ;;  %p35_p1 = scmp.ne.s32.totalorder %s1436_s17, %s1432_s16 }
  0x2c   : > { %p26_p2 = scmp.eq.s32.totalorder %s25_s13, 0  ;;  %p36_p6 = scmp.eq.s32.totalorder %s1440_s18, 0 }
  0x2d   : > { %p1768_p12 = scmp.eq.s32.totalorder %s1507_s19, 1  ;;  %p1221_p7 = scmp.lt.s32.totalorder %s1440_s18, 2 }
  0x2e   : > { %s1574_s20 = scalar_select %p26_p2, %s1436_s17, %s28_s12  }
  0x2f   : > { %p1568_p3 = por %p1768_p12, %p35_p1  ;;  %p37_p9 = por %p36_p6, %p35_p1 }
  0x30   : > { %s183_s24 = sand.u32 1, %s1436_s17   ;;  %s1059_s26 = sshll.u32 %s1440_s18, 6 }
  0x31   : > { %s1769_s14 = scalar_select %p1568_p3, 1, 0 }
  0x32   : > { %s1058_s25 = sshll.u32 %s183_s24, 2  ;;  %s1581_s29 = scalar_lea.hbm %s1755_s0, %s1059_s26 }
  0x33   : > { %s187_s30 = scalar_lea.vmem [#allocation2], %s1058_s25  ;;  %p1583_p11 = pnand %p1221_p7, %p37_p9 }
  0x34   : > { %s194_s5 = sshll.u32 %s187_s30, 4  ;;  %s184_s7 = scalar_lea.sflag [#allocation3], %s183_s24  ;;  %s195_s5 = int_to_ptr.vmem [resolvable:$true] %s194_s5 }
  0x35   : > { %s1344_s8 = scalar_lea.hbm %s1581_s29, 64  ;;  %p1346_p0 = pneg %p1583_p11 }
  0x36   : > { %p1345_p13 = scmp.ne.s32.totalorder %s1581_s29, %s1344_s8  ;;  %s1349_s12 = scalar_lea.hbm %s1755_s0, 128 }
  0x37   : > { %p1350_p1 = scmp.lt.s32.totalorder %s1581_s29, %s1755_s0  ;;  %p1351_p2 = scmp.lt.s32.totalorder %s1349_s12, %s1344_s8 }
  0x38   : > { %p1347_p5 = pnand %p1346_p0, %p1345_p13 }
  0x39   : > { %p1352_p6 = por %p1351_p2, %p1350_p1 }
  0x3a   : > { %p1348_p10 = pneg %p1347_p5 }
  0x3c   : > { %p1353_p12 = pnand %p1352_p6, %p1348_p10 }
  0x3e   : > { %1356 = shalt.err (!%p1353_p12)
}
  0x3f   : > { %s1357_s26 = scalar_lea.vmem %s195_s5, 64  ;;  %s1446_s24 = smov [#allocation2]  }
  0x40   : > { %p1358_p7 = scmp.ne.s32.totalorder %s195_s5, %s1357_s26  ;;  %s1362_s27 = sshll.u32 %s1446_s24, 4  ;;  %s1363_s27 = int_to_ptr.vmem [resolvable:$false] %s1362_s27 }
  0x41   : > { %s1364_s28 = scalar_lea.vmem %s1363_s27, 128  ;;  %p1365_p13 = scmp.lt.s32.totalorder %s195_s5, %s1363_s27 }
  0x42   : > { %p1360_p9 = pnand %p1358_p7, %p1346_p0  ;;  %p1366_p5 = scmp.lt.s32.totalorder %s1364_s28, %s1357_s26 }
  0x44   : > { %p1361_p3 = pneg %p1360_p9  ;;  %p1367_p4 = por %p1366_p5, %p1365_p13 }
  0x46   : > { %p1368_p8 = pnand %p1367_p4, %p1361_p3 }
  0x48   : > { %1371 = shalt.err (!%p1368_p8)
}
  0x49   : > { %1214 = dma.hbm_to_vmem [thread:$0]  (!%p1583_p11), %s1581_s29, 64, %s195_s5, %s184_s7  }
  0x4a   : > { %p1771_p10 = scmp.ne.s32.totalorder %s1766_s23, 0 }
  0x4b   : > { %s1604_s30 = sand.u32 (!%p1771_p10), 1, %s1432_s16   ;;  %p1772_p0 = scmp.ne.s32.totalorder (!%p1771_p10), %s1764_s21, 0 }
  0x4c   : > { %203 = sbr.rel (%p1771_p10) target bundleno = 2869 (0xb35), region = 36  ;;  %s1061_s8 = sshll.u32 (!%p1771_p10), %s1604_s30, 2 }
  0x4d   : > { %s206_s9 = scalar_lea.sflag (!%p1771_p10), [#allocation3], %s1604_s30  ;;  %s209_s10 = scalar_lea.vmem (!%p1771_p10), [#allocation2], %s1061_s8 }
  0x51   : > { %1415 = dma.done.wait (%p1772_p0), %s206_s9, 64  }
  0x52   : > { %1417 = vsyncadd (%p1772_p0), %s206_s9, 4294967232  ;;  %p1773_p4 = scmp.eq.s32.totalorder %s1507_s19, 0 }
  0x54   : > { %1419 = dma.done.wait (%p1773_p4), [#allocation6], 512   ;;  %p1774_p8 = pmov %p1773_p4 }
  0x55   : > { %v1447_v0 = vmov 0.0   ;;  %vm1448_vm0 = vmmov 0   ;;  %v1274_v1 = vld [vmem:[#allocation5 + $0x8] sm:$0xff]   ;;  %v1275_v2 = vld [vmem:[#allocation5] sm:$0xff]   ;;  %v243_v3 = vld [vmem:[%s209_s10] sm:$0xf] }
  0x56   : > { %1421 = vsyncadd (%p1774_p8), [#allocation6], 4294966784  ;;  %1112 = vmatprep.subr.bf16.mxu0 %v1447_v0  ;;  %1116 = vmatprep.mubr.msk.bf16.mxu0 %vm1448_vm0, %v1447_v0  ;;  %vm260_vm1 = vcmask 261120   ;;  %s1449_s21 = smov 64   ;;  %s1450_s23 = smov 96   ;;  %vm379_vm2 = vcmask 1043456  }
  0x57   : > { %1120 = vmatprep.subr.bf16.mxu1 %v1447_v0  ;;  %1122 = vmatprep.mubr.msk.bf16.mxu1 %vm1448_vm0, %v1447_v0  ;;  %vm315_vm3 = vcmask 64512   ;;  %s1451_s29 = smov 56   ;;  %s1452_s5 = smov 88   ;;  %v424_v23 = vld [vmem:[#allocation7] sm:$0xf] }
  0x58   : > { %1113 = vmatpush3.bf16.msra.mxu0 %v1274_v1  ;;  %s1453_s6 = smov 120   ;;  %v429_v24 = vsel %vm379_vm2, %v424_v23, 0  ;;  %s1454_s7 = smov 80   ;;  %v583_v60 = vld [vmem:[#allocation7 + $0x4] sm:$0xf] }
  0x59   : > { %1114 = vmatprep.subr.bf16.mxu0 %v1447_v0  ;;  %s1455_s12 = smov 112   ;;  %v588_v61 = vsel %vm379_vm2, %v583_v60, 0  ;;  %s1456_s13 = smov 48  }
  0x5a   : > { %s1457_s25 = smov 72   ;;  %s1458_s26 = smov 104  }
  0x5b   : > { %s1459_s28 = smov 40   ;;  %s1064_s8 = sshll.u32 %s1604_s30, 3 }
  0x5c   : > { %1115 = vmatpush3.bf16.msra.mxu0 %v1275_v2  ;;  %s1082_s9 = sshll.u32 %s1507_s19, 7  ;;  %s241_s10 = scalar_lea.vmem [#allocation8], %s1064_s8 }
  0x5d   : > { %1126 = vmatprep.subr.bf16.mxu0 %v1447_v0  ;;  %p1775_p11 = scmp.ne.s32.totalorder %s1769_s14, 0 }
  0x5f   : > { %1117 = vmatmul.mubr.msk.bf16.vlgmr.msra.gmra.mxu0 %vm260_vm1, %v243_v3 }
  0x60   : > { %1128 = vmatprep.mubr.msk.bf16.mxu0 %vm1448_vm0, %v1447_v0 }
 0x11f   : > { %v298_v4 = vpop.f32.mrf.mxu0 }
 0x120   : > { %v1627_v5 = vpack.c.bf16 %v298_v4, %v298_v4 }
 0x121   : > { %v1118_v6 = vpop.f32.mrf.mxu0 }
 0x122   : > { %374 = vrot.lane.b32.xlu1 %v1627_v5, %s1449_s21  ;;  %313 = vrot.lane.b32.xlu0 %v1627_v5, %s1450_s23  ;;  %s964_s21 = sshll.u32 %s241_s10, 4  ;;  %s1713_s21 = int_to_ptr.vmem [resolvable:$true] %s964_s21 }
 0x123   : > { %v301_v7 = vpop.f32.mrf.mxu0  ;;  %s1372_s19 = scalar_lea.vmem %s1713_s21, 128 }
 0x124   : > { %p1373_p3 = scmp.ne.s32.totalorder %s1713_s21, %s1372_s19 }
 0x125   : > { %v1119_v8 = vpop.f32.mrf.mxu0 }
 0x126   : > { %p1374_p1 = pnand %p1373_p3, %p1775_p11 }
 0x128   : > { %p1375_p2 = pneg %p1374_p1 }
 0x194   : > { %v375_v9 = vpop.permute.xlu1 %374  ;;  %v314_v10 = vpop.permute.xlu0 %313 }
 0x195   : > { %v381_v11 = vsel %vm379_vm2, %v375_v9, 0  ;;  %v320_v12 = vsel %vm315_vm3, %v314_v10, 0 }
 0x196   : > { %1121 = vmatpush3.bf16.xpose.msra.mxu1 %v320_v12  ;;  %1127 = vmatpush3.bf16.msra.mxu0 %v381_v11 }
 0x197   : > { %1138 = vmatprep.subr.bf16.mxu0 %v1447_v0  ;;  %1132 = vmatprep.subr.bf16.mxu1 %v1447_v0 }
 0x19d   : > { %1123 = vmatmul.mubr.msk.bf16.vlgmr.msra.gmra.mxu1 %vm315_vm3, %v1627_v5 }
 0x19e   : > { %1134 = vmatprep.mubr.msk.bf16.mxu1 %vm1448_vm0, %v1447_v0  ;;  %1133 = vmatpush3.bf16.msra.mxu1 %v429_v24 }
 0x19f   : > { %1144 = vmatprep.subr.bf16.mxu1 %v1447_v0 }
 0x25d   : > { %v356_v13 = vpop.f32.mrf.mxu1 }
 0x25e   : > { %v362_v14 = vsel %vm315_vm3, %v356_v13, -inf }
 0x25f   : > { %363 = vmax.xlane.f32.xlu0 %v362_v14  ;;  %v1124_v15 = vpop.f32.mrf.mxu1 }
 0x261   : > { %v359_v16 = vpop.f32.mrf.mxu1 }
 0x263   : > { %v1125_v17 = vpop.f32.mrf.mxu1 }
 0x264   : > { %v1068_v17 = vld [vmem:[%s1758_s3] ss:$0 sm:$0xff] }
 0x275   : > { %534 = vrot.lane.b32.xlu0 %v1627_v5, %s1451_s29 }
 0x2e8   : > { %v364_v18 = vpop.xlane.xlu0 %363 }
 0x2e9   : > { %v365_v19 = vsub.f32 %v356_v13, %v364_v18 }
 0x2eb   : > { %v366_v20 = vmul.f32 1.442695, %v365_v19 }
 0x2ec   : > { %v535_v32 = vpop.permute.xlu0 %534 }
 0x2ed   : > { %1276 = vpow2.f32 %v366_v20  ;;  %v540_v36 = vsel %vm379_vm2, %v535_v32, 0 }
 0x2fa   : > { %v1277_v21 = vpop.eup %1276 }
 0x2fb   : > { %v368_v22 = vsel %vm315_vm3, %v1277_v21, 0.0 }
 0x2fc   : > { %369 = vadd.xlane.f32.xlu1 %v368_v22 }
 0x30d   : > { %474 = vrot.lane.b32.xlu1 %v1627_v5, %s1452_s5  ;;  %s1711_s5 = scalar_lea.hbm %s1759_s4, %s1082_s9 }
 0x311   : > { %472 = vrot.lane.b32.xlu1 %v1627_v5, %s1453_s6  ;;  %s951_s6 = scalar_lea.sflag [#allocation4], %s1604_s30 }
 0x385   : > { %v370_v25 = vpop.xlane.xlu1 %369 }
 0x386   : > { %1278 = vrcp.f32 %v370_v25 }
 0x389   : > { %v475_v28 = vpop.permute.xlu1 %474 }
 0x38a   : > { %v480_v30 = vsel %vm315_vm3, %v475_v28, 0 }
 0x38d   : > { %v473_v31 = vpop.permute.xlu1 %472 }
 0x393   : > { %v1279_v26 = vpop.eup %1278 }
 0x394   : > { %v372_v27 = vmul.f32 %v1279_v26, %v1277_v21 }
 0x396   : > { %v373_v29 = vpack.c.bf16 %v372_v27, %v372_v27 }
 0x398   : > { %1129 = vmatmul.mubr.msk.bf16.vlgmr.msra.gmra.mxu0 %vm315_vm3, %v373_v29 }
 0x399   : > { %1139 = vmatpush3.bf16.xpose.msra.mxu0 %v480_v30  ;;  %1140 = vmatprep.mubr.msk.bf16.mxu0 %vm1448_vm0, %v1447_v0 }
 0x39a   : > { %1150 = vmatprep.subr.bf16.mxu0 %v1447_v0 }
 0x3a0   : > { %1141 = vmatmul.mubr.msk.bf16.vlgmr.msra.gmra.mxu0 %vm315_vm3, %v473_v31  ;;  %v742_v31 = vld [vmem:[#allocation7 + $0x8] sm:$0xf] }
 0x3a1   : > { %1152 = vmatprep.mubr.msk.bf16.mxu0 %vm1448_vm0, %v1447_v0  ;;  %1151 = vmatpush3.bf16.msra.mxu0 %v588_v61  ;;  %v747_v32 = vsel %vm379_vm2, %v742_v31, 0 }
 0x3a2   : > { %1162 = vmatprep.subr.bf16.mxu0 %v1447_v0 }
 0x458   : > { %v417_v33 = vpop.f32.mrf.mxu0 }
 0x459   : > { %v423_v34 = vpack.c.bf16 %v417_v33, %v417_v33 }
 0x45a   : > { %v1130_v35 = vpop.f32.mrf.mxu0 }
 0x45b   : > { %1135 = vmatmul.mubr.msk.bf16.vlgmr.msra.gmra.mxu1 %vm315_vm3, %v423_v34 }
 0x45c   : > { %1145 = vmatpush3.bf16.msra.mxu1 %v540_v36  ;;  %v420_v37 = vpop.f32.mrf.mxu0  ;;  %1146 = vmatprep.mubr.msk.bf16.mxu1 %vm1448_vm0, %v1447_v0 }
 0x45d   : > { %1156 = vmatprep.subr.bf16.mxu1 %v1447_v0 }
 0x45e   : > { %v1131_v38 = vpop.f32.mrf.mxu0 }
 0x460   : > { %v516_v39 = vpop.f32.mrf.mxu0 }
 0x461   : > { %v522_v40 = vsel %vm315_vm3, %v516_v39, -inf }
 0x462   : > { %523 = vmax.xlane.f32.xlu1 %v522_v40  ;;  %v1142_v41 = vpop.f32.mrf.mxu0 }
 0x464   : > { %v519_v42 = vpop.f32.mrf.mxu0 }
 0x466   : > { %v1143_v43 = vpop.f32.mrf.mxu0 }
 0x4eb   : > { %v524_v44 = vpop.xlane.xlu1 %523 }
 0x4ec   : > { %v525_v45 = vsub.f32 %v516_v39, %v524_v44 }
 0x4ee   : > { %v526_v46 = vmul.f32 1.442695, %v525_v45 }
 0x4f0   : > { %1280 = vpow2.f32 %v526_v46 }
 0x4fd   : > { %v1281_v47 = vpop.eup %1280 }
 0x4fe   : > { %v528_v48 = vsel %vm315_vm3, %v1281_v47, 0.0 }
 0x4ff   : > { %529 = vadd.xlane.f32.xlu0 %v528_v48  ;;  %v901_v48 = vld [vmem:[#allocation7 + $0xc] sm:$0xf] }
 0x515   : > { %633 = vrot.lane.b32.xlu0 %v1627_v5, %s1454_s7  ;;  %s1460_s7 = smov [#allocation8]  }
 0x519   : > { %631 = vrot.lane.b32.xlu0 %v1627_v5, %s1455_s12  ;;  %s1376_s12 = sshll.u32 %s1460_s7, 4  ;;  %s1377_s12 = int_to_ptr.vmem [resolvable:$false] %s1376_s12 }
 0x51a   : > { %p1379_p6 = scmp.lt.s32.totalorder %s1713_s21, %s1377_s12 }
 0x51b   : > { %v465_v49 = vpop.f32.mrf.mxu1 }
 0x51c   : > { %v471_v18 = vadd.f32 %v1068_v17, %v465_v49 }
 0x51d   : > { %v1136_v50 = vpop.f32.mrf.mxu1 }
 0x51e   : > { %v906_v50 = vsel %vm379_vm2, %v901_v48, 0 }
 0x51f   : > { %v468_v51 = vpop.f32.mrf.mxu1 }
 0x521   : > { %v1137_v52 = vpop.f32.mrf.mxu1 }
 0x588   : > { %v530_v53 = vpop.xlane.xlu0 %529 }
 0x589   : > { %1282 = vrcp.f32 %v530_v53 }
 0x58c   : > { %v634_v56 = vpop.permute.xlu0 %633 }
 0x58d   : > { %v639_v58 = vsel %vm315_vm3, %v634_v56, 0 }
 0x590   : > { %v632_v59 = vpop.permute.xlu0 %631 }
 0x596   : > { %v1283_v54 = vpop.eup %1282 }
 0x597   : > { %v532_v55 = vmul.f32 %v1283_v54, %v1281_v47 }
 0x599   : > { %v533_v57 = vpack.c.bf16 %v532_v55, %v532_v55 }
 0x59b   : > { %1147 = vmatmul.mubr.msk.bf16.vlgmr.msra.gmra.mxu1 %vm315_vm3, %v533_v57 }
 0x59c   : > { %1157 = vmatpush3.bf16.xpose.msra.mxu1 %v639_v58  ;;  %1158 = vmatprep.mubr.msk.bf16.mxu1 %vm1448_vm0, %v1447_v0 }
 0x59d   : > { %1168 = vmatprep.subr.bf16.mxu1 %v1447_v0 }
 0x5a3   : > { %1159 = vmatmul.mubr.msk.bf16.vlgmr.msra.gmra.mxu1 %vm315_vm3, %v632_v59 }
 0x5a4   : > { %1170 = vmatprep.mubr.msk.bf16.mxu1 %vm1448_vm0, %v1447_v0  ;;  %1169 = vmatpush3.bf16.msra.mxu1 %v747_v32 }
 0x5a5   : > { %1180 = vmatprep.subr.bf16.mxu1 %v1447_v0 }
 0x65b   : > { %v576_v62 = vpop.f32.mrf.mxu1 }
 0x65c   : > { %v582_v63 = vpack.c.bf16 %v576_v62, %v576_v62 }
 0x65d   : > { %v1148_v1 = vpop.f32.mrf.mxu1 }
 0x65e   : > { %1153 = vmatmul.mubr.msk.bf16.vlgmr.msra.gmra.mxu0 %vm315_vm3, %v582_v63 }
 0x65f   : > { %v579_v2 = vpop.f32.mrf.mxu1  ;;  %1164 = vmatprep.mubr.msk.bf16.mxu0 %vm1448_vm0, %v1447_v0 }
 0x661   : > { %v1149_v3 = vpop.f32.mrf.mxu1 }
 0x663   : > { %v675_v4 = vpop.f32.mrf.mxu1 }
 0x664   : > { %v681_v6 = vsel %vm315_vm3, %v675_v4, -inf }
 0x665   : > { %682 = vmax.xlane.f32.xlu1 %v681_v6  ;;  %v1160_v7 = vpop.f32.mrf.mxu1 }
 0x667   : > { %v678_v8 = vpop.f32.mrf.mxu1 }
 0x669   : > { %v1161_v9 = vpop.f32.mrf.mxu1 }
 0x676   : > { %693 = vrot.lane.b32.xlu1 %v1627_v5, %s1456_s13  ;;  %s1378_s13 = scalar_lea.vmem %s1377_s12, 256 }
 0x677   : > { %p1380_p12 = scmp.lt.s32.totalorder %s1378_s13, %s1372_s19 }
 0x679   : > { %p1381_p7 = por %p1380_p12, %p1379_p6 }
 0x67a   : > { %792 = vrot.lane.b32.xlu1 %v1627_v5, %s1457_s25 }
 0x67b   : > { %p1382_p9 = pnand %p1381_p7, %p1375_p2 }
 0x67e   : > { %790 = vrot.lane.b32.xlu1 %v1627_v5, %s1458_s26 }
 0x6ee   : > { %v683_v10 = vpop.xlane.xlu1 %682 }
 0x6ef   : > { %v684_v11 = vsub.f32 %v675_v4, %v683_v10 }
 0x6f1   : > { %v685_v12 = vmul.f32 1.442695, %v684_v11 }
 0x6f2   : > { %v694_v13 = vpop.permute.xlu1 %693 }
 0x6f3   : > { %1284 = vpow2.f32 %v685_v12  ;;  %v699_v14 = vsel %vm379_vm2, %v694_v13, 0 }
 0x6f4   : > { %1163 = vmatpush3.bf16.msra.mxu0 %v699_v14 }
 0x6f5   : > { %1174 = vmatprep.subr.bf16.mxu0 %v1447_v0 }
 0x6f6   : > { %v793_v27 = vpop.permute.xlu1 %792 }
 0x6f7   : > { %v798_v29 = vsel %vm315_vm3, %v793_v27, 0 }
 0x6fa   : > { %v791_v30 = vpop.permute.xlu1 %790 }
 0x700   : > { %v1285_v15 = vpop.eup %1284 }
 0x701   : > { %v687_v16 = vsel %vm315_vm3, %v1285_v15, 0.0 }
 0x702   : > { %688 = vadd.xlane.f32.xlu0 %v687_v16 }
 0x71e   : > { %v624_v19 = vpop.f32.mrf.mxu0 }
 0x71f   : > { %v630_v20 = vadd.f32 %v624_v19, %v471_v18 }
 0x720   : > { %v1154_v21 = vpop.f32.mrf.mxu0 }
 0x722   : > { %v627_v22 = vpop.f32.mrf.mxu0 }
 0x724   : > { %v1155_v23 = vpop.f32.mrf.mxu0 }
 0x78b   : > { %v689_v24 = vpop.xlane.xlu0 %688 }
 0x78c   : > { %1286 = vrcp.f32 %v689_v24 }
 0x799   : > { %v1287_v25 = vpop.eup %1286 }
 0x79a   : > { %v691_v26 = vmul.f32 %v1287_v25, %v1285_v15 }
 0x79c   : > { %v692_v28 = vpack.c.bf16 %v691_v26, %v691_v26 }
 0x79e   : > { %1165 = vmatmul.mubr.msk.bf16.vlgmr.msra.gmra.mxu0 %vm315_vm3, %v692_v28 }
 0x79f   : > { %1175 = vmatpush3.bf16.xpose.msra.mxu0 %v798_v29  ;;  %1176 = vmatprep.mubr.msk.bf16.mxu0 %vm1448_vm0, %v1447_v0 }
 0x7a0   : > { %1186 = vmatprep.subr.bf16.mxu0 %v1447_v0 }
 0x7a6   : > { %1177 = vmatmul.mubr.msk.bf16.vlgmr.msra.gmra.mxu0 %vm315_vm3, %v791_v30 }
 0x7a7   : > { %1188 = vmatprep.mubr.msk.bf16.mxu0 %vm1448_vm0, %v1447_v0  ;;  %1187 = vmatpush3.bf16.msra.mxu0 %v906_v50 }
 0x85e   : > { %v735_v33 = vpop.f32.mrf.mxu0 }
 0x85f   : > { %v741_v34 = vpack.c.bf16 %v735_v33, %v735_v33 }
 0x860   : > { %v1166_v35 = vpop.f32.mrf.mxu0 }
 0x861   : > { %1171 = vmatmul.mubr.msk.bf16.vlgmr.msra.gmra.mxu1 %vm315_vm3, %v741_v34 }
 0x862   : > { %v738_v36 = vpop.f32.mrf.mxu0  ;;  %1182 = vmatprep.mubr.msk.bf16.mxu1 %vm1448_vm0, %v1447_v0 }
 0x864   : > { %v1167_v37 = vpop.f32.mrf.mxu0 }
 0x866   : > { %v834_v38 = vpop.f32.mrf.mxu0 }
 0x867   : > { %v840_v39 = vsel %vm315_vm3, %v834_v38, -inf }
 0x868   : > { %841 = vmax.xlane.f32.xlu1 %v840_v39  ;;  %v1178_v40 = vpop.f32.mrf.mxu0 }
 0x86a   : > { %v837_v41 = vpop.f32.mrf.mxu0 }
 0x86c   : > { %v1179_v42 = vpop.f32.mrf.mxu0 }
 0x8f1   : > { %v842_v43 = vpop.xlane.xlu1 %841 }
 0x8f2   : > { %v843_v44 = vsub.f32 %v834_v38, %v842_v43 }
 0x8f4   : > { %v844_v45 = vmul.f32 1.442695, %v843_v44 }
 0x8f6   : > { %1288 = vpow2.f32 %v844_v45 }
 0x903   : > { %v1289_v46 = vpop.eup %1288 }
 0x904   : > { %v846_v47 = vsel %vm315_vm3, %v1289_v46, 0.0 }
 0x905   : > { %847 = vadd.xlane.f32.xlu0 %v846_v47 }
 0x91b   : > { %852 = vrot.lane.b32.xlu0 %v1627_v5, %s1459_s28 }
 0x921   : > { %v783_v0 = vpop.f32.mrf.mxu1 }
 0x922   : > { %v789_v49 = vadd.f32 %v783_v0, %v630_v20 }
 0x923   : > { %v1172_v51 = vpop.f32.mrf.mxu1 }
 0x925   : > { %v786_v52 = vpop.f32.mrf.mxu1 }
 0x927   : > { %v1173_v53 = vpop.f32.mrf.mxu1 }
 0x98e   : > { %v848_v54 = vpop.xlane.xlu0 %847 }
 0x98f   : > { %1290 = vrcp.f32 %v848_v54 }
 0x992   : > { %v853_v55 = vpop.permute.xlu0 %852 }
 0x993   : > { %v858_v56 = vsel %vm379_vm2, %v853_v55, 0 }
 0x994   : > { %1181 = vmatpush3.bf16.msra.mxu1 %v858_v56 }
 0x99c   : > { %v1291_v57 = vpop.eup %1290 }
 0x99d   : > { %v850_v58 = vmul.f32 %v1291_v57, %v1289_v46 }
 0x99f   : > { %v851_v5 = vpack.c.bf16 %v850_v58, %v850_v58 }
 0x9a1   : > { %1183 = vmatmul.mubr.msk.bf16.vlgmr.msra.gmra.mxu1 %vm315_vm3, %v851_v5 }
 0xa61   : > { %v894_v59 = vpop.f32.mrf.mxu1 }
 0xa62   : > { %v900_v60 = vpack.c.bf16 %v894_v59, %v894_v59 }
 0xa63   : > { %v1184_v61 = vpop.f32.mrf.mxu1 }
 0xa64   : > { %1189 = vmatmul.mubr.msk.bf16.vlgmr.msra.gmra.mxu0 %vm315_vm3, %v900_v60 }
 0xa65   : > { %v897_v62 = vpop.f32.mrf.mxu1 }
 0xa67   : > { %v1185_v63 = vpop.f32.mrf.mxu1 }
 0xb24   : > { %v942_v1 = vpop.f32.mrf.mxu0 }
 0xb25   : > { %v948_v2 = vadd.f32 %v942_v1, %v789_v49 }
 0xb26   : > { %v1190_v3 = vpop.f32.mrf.mxu0 }
 0xb27   : > { %949 = vst.msk [vmem:[%s241_s10] sm:$0xff] %vm260_vm1, %v948_v2 }
 0xb28   : > { %v945_v4 = vpop.f32.mrf.mxu0 }
 0xb29   : > { %1385 = shalt.err (!%p1382_p9)
}
 0xb2a   : > { %s1386_s25 = scalar_lea.hbm %s1711_s5, 128  ;;  %s1390_s24 = scalar_lea.hbm %s1759_s4, 256 }
 0xb2b   : > { %p1387_p13 = scmp.ne.s32.totalorder %s1711_s5, %s1386_s25  ;;  %p1391_p0 = scmp.lt.s32.totalorder %s1711_s5, %s1759_s4 }
 0xb2c   : > { %p1392_p4 = scmp.lt.s32.totalorder %s1390_s24, %s1386_s25 }
 0xb2d   : > { %p1388_p5 = pnand %p1387_p13, %p1775_p11 }
 0xb2e   : > { %p1393_p8 = por %p1392_p4, %p1391_p0 }
 0xb2f   : > { %p1389_p10 = pneg %p1388_p5 }
 0xb31   : > { %p1394_p3 = pnand %p1393_p8, %p1389_p10 }
 0xb33   : > { %1397 = shalt.err (!%p1394_p3)
}
 0xb34   : > { %1202 = dma.vmem_to_hbm [thread:$0]  (%p1775_p11), %s1713_s21, 128, %s1711_s5, %s951_s6   ;;  %v1191_v6 = vpop.f32.mrf.mxu0 }
 0xb35 PF: > { %s976_s8 = sand.u32 1, %s1428_s15   ;;  %p1776_p1 = scmp.ne.s32.totalorder %s1765_s22, 0 }
 0xb36   : > { %p1777_p2 = scmp.ge.s32.totalorder %s1440_s18, 2  ;;  %s977_s9 = scalar_lea.sflag [#allocation4], %s976_s8 }
 0xb38   : > { %p1216_p6 = pnand %p1777_p2, %p1776_p1 }
 0xb3a   : > { %p1217_p12 = pneg %p1216_p6 }
 0xb3c   : > { %1423 = dma.done.wait (%p1217_p12), %s977_s9, 128  }
 0xb3d   : > { %1425 = vsyncadd (%p1217_p12), %s977_s9, 4294967168  ;;  %p18_p7 = scmp.ge.s32.totalorder %s1558_s11, 4   ;;  %s1778_s15 = smov %s1432_s16 }
 0xb3e   : > { %s1779_s16 = smov %s1436_s17  ;;  %s1780_s17 = smov %s1574_s20 }
 0xb3f   : > { %s1781_s18 = smov %s1558_s11  ;;  %20 = sbr.rel (!%p18_p7) target bundleno = 6 (0x6), region = 89 }
 0xb44   :  { %982 = vsyncpa [#allocation3], 1 }
 0xb45   :  { %984 = vsyncpa [#allocation3 + $0x1], 1 }
 0xb46   :  { %985 = vsyncpa [#allocation6], 1 }
 0xb47   :  { %986 = vsyncpa [#allocation4], 1 }
 0xb48   :  { %988 = vsyncpa [#allocation4 + $0x1], 1 }

</bundles_post_ra>
